<compile_context>
chip_gen: v7x
topology: tpu7x:2x2x1
jax: 0.10.0
libtpu: 0.0.40
codegen_flags: <defaults>
</compile_context>

<pallas_src>
import jax
import jax.numpy as jnp
from jax.experimental import pallas as pl
from jax.experimental.pallas import tpu as pltpu


def _round_up(x: int, m: int) -> int:
    return pl.cdiv(x, m) * m


def _critic_kernel(x_ref, w1_ref, b1_ref, w2_ref, b2_ref, out_ref):
    x = x_ref[...]
    w1 = w1_ref[...]
    if x.dtype != w1.dtype:
        # Cheap VPU cast so the MXU runs its native bf16 path even if the
        # caller hands us f32 observations (no extra wrapper copy / HBM pass).
        x = x.astype(w1.dtype)
    # hidden = relu(x @ W1 + b1), accumulated in f32 on the MXU.
    h = jnp.dot(x, w1, preferred_element_type=jnp.float32)
    h = jnp.maximum(h + b1_ref[...], 0.0)                    # (TB, H) + (1, H)
    # Second layer is a 1-wide matmul: VPU multiply + XLU lane reduce instead
    # of an N=1 GEMM.  Kept in f32 so the ~hidden_size-term reduction holds
    # the tight f32-path tolerance.
    o = jnp.sum(h * w2_ref[...], axis=-1, keepdims=True)     # (TB, 1)
    out_ref[...] = (o + b2_ref[0, 0]).astype(out_ref.dtype)  # scalar bias from SMEM


def all_kc_value_kc_critic(obs, w1, b1, w2, b2, *,
                           block_b: int = 2048,
                           compute_dtype=jnp.bfloat16):
    """Pallas forward pass of AllKCValueKCCritic.

    obs: (B, D) float32 or bfloat16 (bf16 halves the dominant obs DMA traffic)
    w1 : (D, H)          b1: (H,) or (1, H)
    w2 : (H, 1) or (H,)  b2: scalar / (1,) / (1, 1)
    Returns (B, 1) float32.

    compute_dtype controls the MXU input dtype for w1 (and the in-kernel cast
    of obs); accumulation, bias/relu epilogue and the output stay f32.
    """
    obs = jnp.asarray(obs)
    if obs.dtype not in (jnp.dtype(jnp.float32), jnp.dtype(jnp.bfloat16)):
        obs = obs.astype(jnp.float32)
    B, D = obs.shape
    H = w1.shape[1]
    cdt = jnp.dtype(compute_dtype)

    # Weights/biases are tiny: reshape/cast them (one-off, VMEM-resident).
    w1_c = jnp.asarray(w1, cdt).reshape(D, H)
    b1_r = jnp.asarray(b1, jnp.float32).reshape(1, H)
    w2_r = jnp.asarray(w2, jnp.float32).reshape(1, H)
    b2_r = jnp.asarray(b2, jnp.float32).reshape(1, 1)

    # Batch tile: multiple of 8 (sublane rule), at least 2 grid steps for
    # larger batches so both v7x TensorCores get work; last block may be
    # ragged (out-of-bounds output writes are masked, rows are independent).
    if B <= 8:
        tb = B
    else:
        tb = min(_round_up(block_b, 8), _round_up(pl.cdiv(B, 2), 8))
    grid = (pl.cdiv(B, tb),)

    cost = pl.CostEstimate(
        flops=2 * B * D * H + 3 * B * H,
        bytes_accessed=(B * D * obs.dtype.itemsize     # obs (no pad copy)
                        + D * H * cdt.itemsize         # w1 (resident, read once)
                        + 2 * H * 4 + 4                # b1, w2 row, b2
                        + B * 4),                      # output
        transcendentals=0,
    )

    out = pl.pallas_call(
        _critic_kernel,
        out_shape=jax.ShapeDtypeStruct((B, 1), jnp.float32),
        grid=grid,
        in_specs=[
            pl.BlockSpec((tb, D), lambda i: (i, 0)),     # obs: pipelined over batch
            pl.BlockSpec((D, H), lambda i: (0, 0)),      # w1: VMEM-resident
            pl.BlockSpec((1, H), lambda i: (0, 0)),      # b1: resident row
            pl.BlockSpec((1, H), lambda i: (0, 0)),      # w2 as a row vector
            pl.BlockSpec(memory_space=pltpu.MemorySpace.SMEM),  # b2 scalar
        ],
        out_specs=pl.BlockSpec((tb, 1), lambda i: (i, 0)),
        compiler_params=pltpu.CompilerParams(
            # Batch axis is embarrassingly parallel -> shards across both TCs
            # on v7x; no-op on single-TC v5e/v6e.
            dimension_semantics=("parallel",),
            # With tb<=2048: double-buffered obs tile + resident weights + the
            # (tb, H) f32 hidden temporary stays well under 32 MiB on every
            # generation (v7x physical VMEM is 64 MiB).
            vmem_limit_bytes=32 * 1024 * 1024,
        ),
        cost_estimate=cost,
    )(obs, w1_c, b1_r, w2_r, b2_r)
    return out


if __name__ == "__main__":
    key = jax.random.PRNGKey(0)
    k_obs, k1, k2, k3, k4, k_obs2 = jax.random.split(key, 6)

    # Small shapes consistent with the module (real defaults are 300/300).
    B, D, H = 16, 40, 48
    lim1 = 1.0 / (D ** 0.5)
    lim2 = 1.0 / (H ** 0.5)
    obs = jax.random.normal(k_obs, (B, D), jnp.float32)
    w1 = jax.random.uniform(k1, (D, H), jnp.float32, -lim1, lim1)
    b1 = jax.random.uniform(k2, (H,), jnp.float32, -lim1, lim1)
    w2 = jax.random.uniform(k3, (H, 1), jnp.float32, -lim2, lim2)
    b2 = jax.random.uniform(k4, (1,), jnp.float32, -lim2, lim2)

    # Pure-JAX reference of the same semantics.
    ref = jnp.maximum(obs @ w1 + b1[None, :], 0.0) @ w2 + b2[None, :]

    # Default path: bf16 MXU inputs, f32 accumulation / epilogue / output.
    out = jax.block_until_ready(all_kc_value_kc_critic(obs, w1, b1, w2, b2))
    assert out.shape == (B, 1)
    assert jnp.allclose(out, ref, atol=5e-2, rtol=5e-2)

    # Full f32 path must hold the tight tolerance.
    out_f32 = jax.block_until_ready(
        all_kc_value_kc_critic(obs, w1, b1, w2, b2, compute_dtype=jnp.float32))
    assert out_f32.shape == (B, 1)
    assert jnp.allclose(out_f32, ref, atol=1e-5, rtol=1e-5)

    # Ragged batch: grid of 2 with a masked partial last block (no batch pad).
    B2 = 37
    obs2 = jax.random.normal(k_obs2, (B2, D), jnp.float32)
    ref2 = jnp.maximum(obs2 @ w1 + b1[None, :], 0.0) @ w2 + b2[None, :]
    out2 = jax.block_until_ready(
        all_kc_value_kc_critic(obs2, w1, b1, w2, b2, compute_dtype=jnp.float32))
    assert out2.shape == (B2, 1)
    assert jnp.allclose(out2, ref2, atol=1e-5, rtol=1e-5)

    # bf16-stored observations (halved obs DMA bytes) through the same kernel.
    out_bf = jax.block_until_ready(
        all_kc_value_kc_critic(obs.astype(jnp.bfloat16), w1, b1, w2, b2))
    assert out_bf.shape == (B, 1)
    assert jnp.allclose(out_bf, ref, atol=5e-2, rtol=5e-2)

    # TODO(synk): log_path CSV logging in the original module is host-side I/O
    # and is intentionally not replicated.
    print("KERNEL_OK")
</pallas_src>

<mosaic_0001>
module attributes {stable_mosaic.version = 11 : i64} {
  func.func @_critic_kernel(%arg0: i32, %arg1: memref<8x40xf32, #tpu.memory_space<vmem>>, %arg2: memref<40x48xbf16, #tpu.memory_space<vmem>>, %arg3: memref<1x48xf32, #tpu.memory_space<vmem>>, %arg4: memref<1x48xf32, #tpu.memory_space<vmem>>, %arg5: memref<1x1xf32, #tpu.memory_space<smem>>, %arg6: memref<8x1xf32, #tpu.memory_space<vmem>>) attributes {dimension_semantics = [#tpu.dimension_semantics<parallel>], iteration_bounds = array<i64: 2>, scalar_prefetch = 0 : i64, scratch_operands = 0 : i64, tpu.core_type = #tpu.core_type<tc>, window_params = [{transform_indices = @transform_0, window_bounds = array<i64: 8, 40>}, {pipeline_mode = #tpu.pipeline_mode<synchronous>, transform_indices = @transform_1, window_bounds = array<i64: 40, 48>}, {pipeline_mode = #tpu.pipeline_mode<synchronous>, transform_indices = @transform_2, window_bounds = array<i64: 1, 48>}, {pipeline_mode = #tpu.pipeline_mode<synchronous>, transform_indices = @transform_3, window_bounds = array<i64: 1, 48>}, {transform_indices = @transform_4, window_bounds = array<i64: 1, 1>}, {transform_indices = @transform_5, window_bounds = array<i64: 8, 1>}]} {
    %c0 = arith.constant 0 : index
    %c0_0 = arith.constant 0 : index
    %0 = vector.load %arg1[%c0, %c0_0] : memref<8x40xf32, #tpu.memory_space<vmem>>, vector<8x40xf32>
    %c0_1 = arith.constant 0 : index
    %c0_2 = arith.constant 0 : index
    %1 = vector.load %arg2[%c0_1, %c0_2] : memref<40x48xbf16, #tpu.memory_space<vmem>>, vector<40x48xbf16>
    %2 = arith.truncf %0 : vector<8x40xf32> to vector<8x40xbf16>
    %cst = arith.constant dense<0.000000e+00> : vector<8x48xf32>
    %3 = tpu.matmul %2, %1, %cst {dimension_numbers = #tpu.dot_dimension_numbers<[1], [0], [0], [1], [0, 0, 1, 1], [], []>} : vector<8x40xbf16>, vector<40x48xbf16>, vector<8x48xf32> -> vector<8x48xf32>
    %c0_3 = arith.constant 0 : index
    %c0_4 = arith.constant 0 : index
    %4 = vector.load %arg3[%c0_3, %c0_4] : memref<1x48xf32, #tpu.memory_space<vmem>>, vector<1x48xf32>
    %5 = vector.broadcast %4 : vector<1x48xf32> to vector<8x48xf32>
    %6 = arith.addf %3, %5 : vector<8x48xf32>
    %cst_5 = arith.constant 0.000000e+00 : f32
    %7 = vector.broadcast %cst_5 : f32 to vector<8x48xf32>
    %8 = arith.maximumf %6, %7 : vector<8x48xf32>
    %c0_6 = arith.constant 0 : index
    %c0_7 = arith.constant 0 : index
    %9 = vector.load %arg4[%c0_6, %c0_7] : memref<1x48xf32, #tpu.memory_space<vmem>>, vector<1x48xf32>
    %10 = vector.broadcast %9 : vector<1x48xf32> to vector<8x48xf32>
    %11 = arith.mulf %8, %10 : vector<8x48xf32>
    %cst_8 = arith.constant dense<0.000000e+00> : vector<8xf32>
    %12 = vector.multi_reduction <add>, %11, %cst_8 [1] : vector<8x48xf32> to vector<8xf32>
    %13 = vector.shape_cast %12 : vector<8xf32> to vector<8x1xf32>
    %c0_9 = arith.constant 0 : index
    %c0_10 = arith.constant 0 : index
    %14 = memref.load %arg5[%c0_9, %c0_10] : memref<1x1xf32, #tpu.memory_space<smem>>
    %15 = vector.broadcast %14 : f32 to vector<8x1xf32>
    %16 = arith.addf %13, %15 : vector<8x1xf32>
    %c0_11 = arith.constant 0 : index
    %c0_12 = arith.constant 0 : index
    %17 = vector.load %arg6[%c0_11, %c0_12] : memref<8x1xf32, #tpu.memory_space<vmem>>, vector<8x1xf32>
    tpu.vector_store %arg6[%c0_11, %c0_12], %16 {strides = array<i32>} : memref<8x1xf32, #tpu.memory_space<vmem>>, vector<8x1xf32>,
    return
  }
  func.func @transform_0(%arg0: i32) -> (i32, i32) {
    %c0_i32 = arith.constant 0 : i32
    %c0_i32_0 = arith.constant 0 : i32
    return %arg0, %c0_i32 : i32, i32
  }
  func.func @transform_1(%arg0: i32) -> (i32, i32) {
    %c0_i32 = arith.constant 0 : i32
    %c0_i32_0 = arith.constant 0 : i32
    %c0_i32_1 = arith.constant 0 : i32
    return %c0_i32, %c0_i32_0 : i32, i32
  }
  func.func @transform_2(%arg0: i32) -> (i32, i32) {
    %c0_i32 = arith.constant 0 : i32
    %c0_i32_0 = arith.constant 0 : i32
    %c0_i32_1 = arith.constant 0 : i32
    return %c0_i32, %c0_i32_0 : i32, i32
  }
  func.func @transform_3(%arg0: i32) -> (i32, i32) {
    %c0_i32 = arith.constant 0 : i32
    %c0_i32_0 = arith.constant 0 : i32
    %c0_i32_1 = arith.constant 0 : i32
    return %c0_i32, %c0_i32_0 : i32, i32
  }
  func.func @transform_4(%arg0: i32) -> (i32, i32) {
    %c0_i32 = arith.constant 0 : i32
    %c0_i32_0 = arith.constant 0 : i32
    %c0_i32_1 = arith.constant 0 : i32
    return %c0_i32, %c0_i32_0 : i32, i32
  }
  func.func @transform_5(%arg0: i32) -> (i32, i32) {
    %c0_i32 = arith.constant 0 : i32
    %c0_i32_0 = arith.constant 0 : i32
    return %arg0, %c0_i32 : i32, i32
  }
}

</mosaic_0001>

<bundles_post_ra>
// kernel: tpu_custom_call.1
= control target key start
LH: loop header
LB: loop body
LE: loop exit
PB: predicated region body
PF: predicated region fallthrough
CT: control target
= control target key end

     0   :  { %s798_s0 = inlined_call_operand.hbm [shape: f32[16,40], index: 0, kind: input, shape index: {}]   ;;  %s799_s1 = inlined_call_operand.hbm [shape: bf16[40,48], index: 1, kind: input, shape index: {}]   ;;  %s800_s2 = inlined_call_operand.vmem [shape: f32[1,48], index: 2, kind: input, shape index: {}]   ;;  %s801_s3 = inlined_call_operand.vmem [shape: f32[1,48], index: 3, kind: input, shape index: {}]   ;;  %s802_s4 = inlined_call_operand.<no memory space> [shape: f32[1,1], index: 4, kind: input, shape index: {}]   ;;  %s803_s5 = inlined_call_operand.vmem [shape: f32[16,1], index: 5, kind: output, shape index: {}]  }
   0x1   :  { %10 = sst [smem:[#allocation2]] %s802_s4 }
   0x2   :  { %11 = vsyncpa [#allocation4], 0 }
   0x3   :  { %13 = vsyncpa [#allocation4 + $0x1], 0 }
   0x4   :  { %14 = vsyncpa [#allocation6], 0  ;;  %s653_s20 = smov 0   ;;  %s655_s21 = smov 0  }
   0x5   :  { %s657_s22 = smov 0   ;;  %s659_s23 = smov 0  }
   0x6 LB: > { %s672_s4 = sadd.s32 4294967295, %s612_s23   ;;  %p40_p0 = scmp.ne.s32.totalorder %s604_s21, %s600_s20  ;;  %s612_s23 = sphi %s659_s23, %s818_s23   ;;  %s608_s22 = sphi %s657_s22, %s817_s22   ;;  %s604_s21 = sphi %s655_s21, %s816_s21   ;;  %s600_s20 = sphi %s653_s20, %s815_s20  }
   0x7   : > { %p804_p1 = scmp.eq.s32.totalorder %s672_s4, 0  ;;  %p428_p2 = scmp.ge.s32.totalorder %s612_s23, 1 }
   0x8   : > { %p161_p3 = scmp.lt.s32.totalorder %s612_s23, 3  ;;  %s614_s26 = smov [#allocation5]  }
   0x9   : > { %p680_p4 = por %p804_p1, %p40_p0  ;;  %s173_s27 = sshll.u32 %s614_s26, 4  ;;  %s174_s27 = int_to_ptr.vmem [resolvable:$true] %s173_s27 }
   0xa   : > { %p684_p5 = pnand %p428_p2, %p161_p3  ;;  %s697_s29 = sadd.s32 1, %s612_s23  }
   0xb   : > { %s807_s24 = scalar_select %p680_p4, 1, 0 }
   0xc   : > { %s808_s25 = scalar_select %p684_p5, 1, 0 }
   0xd   : > { %p465_p6 = pneg %p684_p5  ;;  %s27_s30 = sadd.s32 1, %s608_s22 }
   0xe   : > { %s24_s6 = ssub.s32 %s612_s23, %s697_s29  ;;  %s516_s9 = scalar_lea.hbm %s799_s1, 320 }
   0xf   : > { %p692_p7 = pnand %p465_p6, %p804_p1  ;;  %p517_p8 = scmp.ne.s32.totalorder %s799_s1, %s516_s9 }
  0x10   : > { %p523_p12 = scmp.lt.u32.totalorder %s516_s9, %s799_s1 }
  0x11   : > { %p518_p9 = pneg %p692_p7 }
  0x13   : > { %p519_p10 = pnand %p518_p9, %p517_p8 }
  0x15   : > { %p520_p11 = pneg %p519_p10 }
  0x17   : > { %p525_p13 = pnand %p523_p12, %p520_p11 }
  0x19   : > { %528 = shalt.err (!%p525_p13)
}
  0x1a   : > { %s529_s14 = scalar_lea.vmem %s174_s27, 320  ;;  %p537_p6 = scmp.lt.s32.totalorder %s174_s27, %s174_s27 }
  0x1b   : > { %p530_p0 = scmp.ne.s32.totalorder %s174_s27, %s529_s14  ;;  %p538_p1 = scmp.lt.s32.totalorder %s529_s14, %s529_s14 }
  0x1d   : > { %p532_p2 = pnand %p530_p0, %p518_p9  ;;  %p539_p4 = por %p538_p1, %p537_p6 }
  0x1f   : > { %p533_p3 = pneg %p532_p2 }
  0x21   : > { %p540_p5 = pnand %p539_p4, %p533_p3 }
  0x23   : > { %543 = shalt.err (!%p540_p5)
}
  0x24   : > { %s615_s15 = smov 64   ;;  %s616_s16 = smov 4  }
  0x25   : > { %468 = dma.hbm_to_vmem [thread:$0]  (!%p692_p7), %s799_s1, 320, %s174_s27, [#allocation6], %s615_s15, %s615_s15, %s616_s16  }
  0x26   : > { %p25_p8 = scmp.eq.s32.totalorder %s24_s6, 0  ;;  %p34_p9 = scmp.ne.s32.totalorder %s608_s22, %s604_s21 }
  0x27   : > { %p35_p1 = scmp.eq.s32.totalorder %s612_s23, 0  ;;  %p474_p4 = scmp.lt.s32.totalorder %s612_s23, 2 }
  0x28   : > { %s723_s19 = scalar_select %p25_p8, %s608_s22, %s27_s30  }
  0x29   : > { %p36_p5 = por %p35_p1, %p34_p9  ;;  %s196_s20 = sand.u32 1, %s608_s22  }
  0x2a   : > { %s431_s26 = sshll.u32 %s196_s20, 3  ;;  %s432_s7 = sshll.u32 %s612_s23, 7 }
  0x2b   : > { %s730_s10 = scalar_lea.hbm %s798_s0, %s432_s7  ;;  %s200_s27 = scalar_lea.vmem [#allocation3], %s431_s26 }
  0x2c   : > { %s207_s28 = sshll.u32 %s200_s27, 4  ;;  %p734_p7 = pnand %p474_p4, %p36_p5  ;;  %s732_s28 = int_to_ptr.vmem [resolvable:$true] %s207_s28 }
  0x2d   : > { %s197_s23 = scalar_lea.sflag [#allocation4], %s196_s20  ;;  %s544_s6 = scalar_lea.hbm %s730_s10, 128 }
  0x2e   : > { %p545_p10 = scmp.ne.s32.totalorder %s730_s10, %s544_s6  ;;  %p546_p11 = pneg %p734_p7 }
  0x2f   : > { %s549_s13 = scalar_lea.hbm %s798_s0, 256  ;;  %p550_p0 = scmp.lt.u32.totalorder %s730_s10, %s798_s0 }
  0x30   : > { %p547_p12 = pnand %p546_p11, %p545_p10  ;;  %p551_p2 = scmp.lt.u32.totalorder %s549_s13, %s544_s6 }
  0x31   : > { %p553_p6 = scmp.lt.u32.totalorder %s544_s6, %s730_s10 }
  0x32   : > { %p548_p13 = pneg %p547_p12  ;;  %p552_p3 = por %p551_p2, %p550_p0 }
  0x34   : > { %p554_p8 = por %p553_p6, %p552_p3 }
  0x36   : > { %p555_p9 = pnand %p554_p8, %p548_p13 }
  0x38   : > { %558 = shalt.err (!%p555_p9)
}
  0x39   : > { %s559_s16 = scalar_lea.vmem %s732_s28, 128  ;;  %s617_s17 = smov [#allocation3]  }
  0x3a   : > { %p560_p1 = scmp.ne.s32.totalorder %s732_s28, %s559_s16  ;;  %s564_s18 = sshll.u32 %s617_s17, 4  ;;  %s565_s18 = int_to_ptr.vmem [resolvable:$false] %s564_s18 }
  0x3b   : > { %s566_s20 = scalar_lea.vmem %s565_s18, 256  ;;  %p567_p10 = scmp.lt.s32.totalorder %s732_s28, %s565_s18 }
  0x3c   : > { %p562_p4 = pnand %p560_p1, %p546_p11  ;;  %p568_p12 = scmp.lt.s32.totalorder %s566_s20, %s559_s16 }
  0x3e   : > { %p563_p5 = pneg %p562_p4  ;;  %p569_p0 = por %p568_p12, %p567_p10 }
  0x40   : > { %p570_p2 = pnand %p569_p0, %p563_p5 }
  0x42   : > { %573 = shalt.err (!%p570_p2)
}
  0x43   : > { %472 = dma.hbm_to_vmem [thread:$0]  (!%p734_p7), %s730_s10, 128, %s732_s28, %s197_s23  }
  0x44   : > { %p811_p13 = scmp.ne.s32.totalorder %s808_s25, 0 }
  0x45   : > { %s218_s26 = sand.u32 (!%p811_p13), 1, %s604_s21   ;;  %p812_p11 = scmp.ne.s32.totalorder (!%p811_p13), %s807_s24, 0 }
  0x46   : > { %216 = sbr.rel (%p811_p13) target bundleno = 458 (0x1ca), region = 40  ;;  %s434_s7 = sshll.u32 (!%p811_p13), %s218_s26, 3 }
  0x47   : > { %s219_s8 = scalar_lea.sflag (!%p811_p13), [#allocation4], %s218_s26  ;;  %s222_s9 = scalar_lea.vmem (!%p811_p13), [#allocation3], %s434_s7 }
  0x4d   : > { %591 = dma.done.wait (%p812_p11), %s219_s8, 128  }
  0x4e   : > { %593 = vsyncadd (%p812_p11), %s219_s8, 4294967168  ;;  %p813_p3 = scmp.eq.s32.totalorder %s672_s4, 0 }
  0x50   : > { %595 = dma.done.wait (%p813_p3), [#allocation6], 320   ;;  %p814_p6 = pmov %p813_p3 }
  0x51   : > { %v618_v0 = vmov 0.0   ;;  %vm619_vm0 = vmmov 0   ;;  %v513_v1 = vld [vmem:[#allocation5] sm:$0xff]   ;;  %v514_v2 = vld [vmem:[#allocation5 + $0x8] sm:$0xff]   ;;  %v515_v3 = vld [vmem:[#allocation5 + $0x10] ss:$0 sps:$4 sm:$0xff]  }
  0x52   : > { %597 = vsyncadd (%p814_p6), [#allocation6], 4294966976  ;;  %449 = vmatprep.subr.bf16.mxu0 %v618_v0  ;;  %455 = vmatprep.mubr.msk.bf16.mxu0 %vm619_vm0, %v618_v0  ;;  %vm290_vm1 = vcmask 1043456   ;;  %v257_v4 = vld [vmem:[%s222_s9] sm:$0xff]  ;;  %vm286_vm2 = vcmask 326656   ;;  %vm343_vm3 = vcmask 392192  }
  0x53   : > { %450 = vmatpush3.bf16.msra.mxu0 %v513_v1  ;;  %v292_v5 = vsel %vm290_vm1, %v515_v3, 0  ;;  %v263_v6 = vpack.c.bf16 %v257_v4, %v257_v4  ;;  %v437_v7 = vld [vmem:[%s800_s2] ss:$0 sm:$0xff]  ;;  %p252_p7 = scmp.lt.s32.totalorder %s672_s4, 1  ;;  %s347_s28 = sld [smem:[#allocation2]]  ;;  %vm350_vm4 = vcmask 7168  }
  0x54   : > { %451 = vmatprep.subr.bf16.mxu0 %v618_v0  ;;  %v442_v12 = vld [vmem:[%s801_s3] ss:$0 sm:$0xff] }
  0x55   : > { %s820_s4 = smov (!%p252_p7, %s672_s4), 1 }
  0x56   : > { %s436_s30 = sshll.u32 %s820_s4, 3 }
  0x57   : > { %452 = vmatpush3.bf16.msra.mxu0 %v514_v2  ;;  %s255_s11 = scalar_lea.vmem %s803_s5, %s436_s30 }
  0x58   : > { %453 = vmatprep.subr.bf16.mxu0 %v618_v0 }
  0x59   : > { %v348_v17 = vstv %s347_s28 }
  0x5b   : > { %454 = vmatpush3.bf16.msra.mxu0 %v292_v5 }
  0x5e   : > { %456 = vmatmul.mubr.msk.bf16.vlgmr.msra.gmra.mrb[0].mxu0 %vm286_vm2, %v263_v6 }
 0x131   : > { %v328_v8 = vpop.f32.mrb[0].mxu0 }
 0x132   : > { %v329_v9 = vadd.f32 %v437_v7, %v328_v8  ;;  %v457_v10 = vpop.f32.mrb[1].mxu0 }
 0x133   : > { %v331_v11 = vpop.f32.mrb[2].mxu0 }
 0x134   : > { %v334_v13 = vmax.f32 %v329_v9, 0.0  ;;  %v458_v14 = vpop.f32.mrb[3].mxu0 }
 0x136   : > { %v342_v15 = vmul.f32 %v442_v12, %v334_v13 }
 0x138   : > { %v344_v16 = vsel %vm343_vm3, %v342_v15, 0.0 }
 0x139   : > { %345 = vadd.xlane.f32.xlu0 %v344_v16 }
 0x1c6   : > { %v346_v18 = vpop.xlane.xlu0 %345 }
 0x1c7   : > { %v349_v19 = vadd.f32 %v348_v17, %v346_v18 }
 0x1c9   : > { %351 = vst.msk [vmem:[%s255_s11] sm:$0xff] %vm350_vm4, %v349_v19 }
 0x1ca PF: > { %p17_p8 = scmp.ge.s32.totalorder %s697_s29, 4   ;;  %s815_s20 = smov %s604_s21 }
 0x1cb   : > { %s816_s21 = smov %s608_s22  ;;  %s817_s22 = smov %s723_s19 }
 0x1cc   : > { %s818_s23 = smov %s697_s29  ;;  %19 = sbr.rel (!%p17_p8) target bundleno = 6 (0x6), region = 84 }
 0x1d3   :  { %371 = vsyncpa [#allocation4], 1 }
 0x1d4   :  { %373 = vsyncpa [#allocation4 + $0x1], 1 }
 0x1d5   :  { %374 = vsyncpa [#allocation6], 1 }

</bundles_post_ra>
